<compile_context>
chip_gen: v7x
topology: tpu7x:2x2x1
jax: 0.10.0
libtpu: 0.0.40
codegen_flags: <defaults>
</compile_context>

<pallas_src>
import functools
import math

import jax
import jax.numpy as jnp
from jax.experimental import pallas as pl
from jax.experimental.pallas import tpu as pltpu


def _round_up(x, m):
    return (x + m - 1) // m * m


# Tiling policy (shared by init and the wrapper so padded shapes agree).
_K_TILE_MAX = 1024   # single K block (no K padding/tiling) up to this size
_C_TILE_MAX = 512    # feature-tile upper bound (multiple of 128)


def _pick_tile(total, preferred):
    """Largest multiple of 128 <= preferred that divides `total` (a mult. of 128)."""
    t = min(total, preferred)
    while total % t:
        t -= 128
    return t


# ------------------------------- Pallas kernel ------------------------------

def _linear_bn_relu_kernel(x_ref, w_ref, g_ref, beta_ref, o_ref, acc_ref, *,
                           n_valid, eps):
    """Fused Linear -> BatchNorm1d(training stats) -> ReLU.

    Grid = (C tiles ["parallel"], K tiles ["arbitrary"]).

    x_ref:    (Np, TK)  input rows (bf16); rows >= n_valid are zero padding
    w_ref:    (TK, TC)  weight tile (bf16), already transposed to (in, out)
    g_ref:    (1, TC)   BN gamma (f32)
    beta_ref: (1, TC)   BN beta  (f32)
    o_ref:    (Np, TC)  output (f32); rows >= n_valid are garbage (sliced off)
    acc_ref:  (Np, TC)  f32 accumulator scratch (pre-activation, VMEM resident)
    """
    k = pl.program_id(1)

    @pl.when(k == 0)
    def _():
        acc_ref[...] = jnp.zeros_like(acc_ref)

    # bf16 x bf16 -> f32 accumulation on the MXU.
    acc_ref[...] += jnp.dot(x_ref[...], w_ref[...],
                            preferred_element_type=jnp.float32)

    @pl.when(k == pl.num_programs(1) - 1)
    def _():
        h = acc_ref[...]
        inv_n = 1.0 / float(n_valid)
        # Padded batch rows of x are zero and there is no bias add, so padded
        # rows of h are exactly zero: the plain column sum already equals the
        # sum over valid rows.
        mean = jnp.sum(h, axis=0, keepdims=True) * inv_n
        centered = h - mean
        sq = centered * centered
        if n_valid != acc_ref.shape[0]:
            # Only when the batch is not 8-aligned: padded rows would otherwise
            # contribute (-mean)^2 to the variance.
            rows = jax.lax.broadcasted_iota(jnp.int32, sq.shape, 0)
            sq = jnp.where(rows < n_valid, sq, 0.0)
        var = jnp.sum(sq, axis=0, keepdims=True) * inv_n          # biased
        scale = g_ref[...] * jax.lax.rsqrt(var + eps)
        o_ref[...] = jnp.maximum(centered * scale + beta_ref[...], 0.0)


# ------------------------------ kernel wrapper -------------------------------

def linear_bn_relu(x, w_p, gamma_p, beta_p, *, out_features, eps=1e-5,
                   mxu_dtype=jnp.bfloat16):
    """x: (N, K) f32.  w_p: (Kp, Cp) pre-padded/transposed (bf16).
    gamma_p/beta_p: (1, Cp) f32.  Returns (N, out_features) f32."""
    N, K = x.shape
    Kp, Cp = w_p.shape
    Np = _round_up(N, 8)

    # Pad x only when actually misaligned (otherwise no extra XLA copy).
    if Np != N or Kp != K:
        x = jnp.pad(x, ((0, Np - N), (0, Kp - K)))
    x = x.astype(mxu_dtype)

    # Feature tiling (independent per-feature BN stats -> exact per C tile).
    c_tile = _pick_tile(Cp, _C_TILE_MAX)
    # K tiling only when a single K block would be too big; otherwise the block
    # spans the full (unpadded) K, which waives the 128-lane divisibility rule.
    k_tile = _pick_tile(Kp, _K_TILE_MAX) if Kp > _K_TILE_MAX else Kp
    n_c, n_k = Cp // c_tile, Kp // k_tile

    # Scoped-VMEM budget for the chosen tiles (double-buffered inputs/outputs
    # + f32 accumulator), with headroom; capped below v7x's 64 MiB physical.
    isz = jnp.dtype(mxu_dtype).itemsize
    est = (2 * (Np * k_tile + k_tile * c_tile) * isz    # x / w tiles, 2 buffers
           + 2 * Np * c_tile * 4                        # output tiles, 2 buffers
           + Np * c_tile * 4                            # accumulator scratch
           + 4 * 2 * c_tile * 4)                        # gamma / beta tiles
    vmem_limit = int(min(max(2 * est, 32 << 20), 48 << 20))

    out = pl.pallas_call(
        functools.partial(_linear_bn_relu_kernel, n_valid=N, eps=eps),
        out_shape=jax.ShapeDtypeStruct((Np, Cp), jnp.float32),
        grid_spec=pltpu.PrefetchScalarGridSpec(
            num_scalar_prefetch=0,
            grid=(n_c, n_k),
            in_specs=[
                pl.BlockSpec((Np, k_tile), lambda c, k: (0, k)),      # x
                pl.BlockSpec((k_tile, c_tile), lambda c, k: (k, c)),  # w
                pl.BlockSpec((1, c_tile), lambda c, k: (0, c)),       # gamma
                pl.BlockSpec((1, c_tile), lambda c, k: (0, c)),       # beta
            ],
            out_specs=pl.BlockSpec((Np, c_tile), lambda c, k: (0, c)),
            scratch_shapes=[pltpu.VMEM((Np, c_tile), jnp.float32)]),
        compiler_params=pltpu.CompilerParams(
            dimension_semantics=("parallel", "arbitrary"),
            vmem_limit_bytes=vmem_limit),
    )(x, w_p, gamma_p, beta_p)

    if Np != N or Cp != out_features:
        out = out[:N, :out_features]
    return out


# ----------------------------- parameter init --------------------------------

def init_linear_bnr_params(key, in_features, out_features,
                           mxu_dtype=jnp.bfloat16):
    """PyTorch: xavier_uniform_ Linear.weight (out, in), zero bias, BN gamma=1,
    beta=0.  Padding/transpose/bf16 cast are done ONCE here (hoisted out of the
    forward).  The zero linear bias is dropped entirely: BN centering cancels
    any bias, so it never affects the forward output."""
    bound = math.sqrt(6.0 / (in_features + out_features))
    w_oi = jax.random.uniform(key, (out_features, in_features), jnp.float32,
                              -bound, bound)
    w = jnp.transpose(w_oi)                                   # (K, C)

    Cp = _round_up(out_features, 128)
    Kp = _round_up(in_features, 128) if in_features > _K_TILE_MAX else in_features
    if (Kp, Cp) != (in_features, out_features):
        w = jnp.pad(w, ((0, Kp - in_features), (0, Cp - out_features)))
    gamma = jnp.pad(jnp.ones((out_features,), jnp.float32),
                    (0, Cp - out_features), constant_values=1.0)
    beta = jnp.pad(jnp.zeros((out_features,), jnp.float32),
                   (0, Cp - out_features))
    return {
        "w": w.astype(mxu_dtype),          # (Kp, Cp) bf16, ready for the MXU
        "gamma": gamma.reshape(1, Cp),     # (1, Cp) f32
        "beta": beta.reshape(1, Cp),       # (1, Cp) f32
    }


def linear_bnr_forward(params, x, *, out_features):
    return linear_bn_relu(x, params["w"], params["gamma"], params["beta"],
                          out_features=out_features)


# ---------------------------------- main -------------------------------------

if __name__ == "__main__":
    batch, in_features, out_features = 8, 64, 128

    key = jax.random.PRNGKey(0)
    kparam, kx = jax.random.split(key)
    params = init_linear_bnr_params(kparam, in_features, out_features)
    x = jax.random.normal(kx, (batch, in_features), jnp.float32)

    fwd = jax.jit(functools.partial(linear_bnr_forward,
                                    out_features=out_features))
    out = fwd(params, x)
    jax.block_until_ready(out)

    # Pure-JAX reference with PyTorch training-mode BatchNorm1d semantics,
    # using the same bf16-rounded operands the kernel consumes (f32 math).
    w_used = params["w"][:in_features, :out_features].astype(jnp.float32)
    x_used = x.astype(jnp.bfloat16).astype(jnp.float32)
    g_used = params["gamma"][:, :out_features]
    b_used = params["beta"][:, :out_features]
    h = x_used @ w_used
    mean = jnp.mean(h, axis=0)
    var = jnp.mean((h - mean) ** 2, axis=0)                  # biased variance
    ref = jnp.maximum((h - mean) * (g_used / jnp.sqrt(var + 1e-5)) + b_used,
                      0.0)

    assert out.shape == (batch, out_features)
    assert bool(jnp.all(jnp.isfinite(out)))
    assert bool(jnp.all(out >= 0.0))                         # ReLU range
    assert bool(jnp.allclose(out, ref, atol=2e-3, rtol=2e-3))
    print("KERNEL_OK")
</pallas_src>

<mosaic_0001>
module attributes {stable_mosaic.version = 11 : i64} {
  func.func @_linear_bn_relu_kernel(%arg0: i32, %arg1: i32, %arg2: memref<8x64xbf16, #tpu.memory_space<vmem>>, %arg3: memref<64x128xbf16, #tpu.memory_space<vmem>>, %arg4: memref<1x128xf32, #tpu.memory_space<vmem>>, %arg5: memref<1x128xf32, #tpu.memory_space<vmem>>, %arg6: memref<8x128xf32, #tpu.memory_space<vmem>>, %arg7: memref<8x128xf32, #tpu.memory_space<vmem>>) attributes {dimension_semantics = [#tpu.dimension_semantics<parallel>, #tpu.dimension_semantics<arbitrary>], iteration_bounds = array<i64: 1, 1>, scalar_prefetch = 0 : i64, scratch_operands = 1 : i64, tpu.core_type = #tpu.core_type<tc>, window_params = [{transform_indices = @transform_0, window_bounds = array<i64: 8, 64>}, {transform_indices = @transform_1, window_bounds = array<i64: 64, 128>}, {transform_indices = @transform_2, window_bounds = array<i64: 1, 128>}, {transform_indices = @transform_3, window_bounds = array<i64: 1, 128>}, {transform_indices = @transform_4, window_bounds = array<i64: 8, 128>}]} {
    %c0_i32 = arith.constant 0 : i32
    %0 = arith.cmpi eq, %arg1, %c0_i32 : i32
    %1 = arith.extui %0 : i1 to i32
    %c0_i32_0 = arith.constant 0 : i32
    %2 = arith.cmpi ne, %1, %c0_i32_0 : i32
    scf.if %2 {
      %cst_10 = arith.constant 0.000000e+00 : f32
      %12 = vector.broadcast %cst_10 : f32 to vector<8x128xf32>
      %c0_11 = arith.constant 0 : index
      %c0_12 = arith.constant 0 : index
      %13 = vector.load %arg7[%c0_11, %c0_12] : memref<8x128xf32, #tpu.memory_space<vmem>>, vector<8x128xf32>
      tpu.vector_store %arg7[%c0_11, %c0_12], %12 {strides = array<i32>} : memref<8x128xf32, #tpu.memory_space<vmem>>, vector<8x128xf32>,
    } else {
    }
    %c0 = arith.constant 0 : index
    %c0_1 = arith.constant 0 : index
    %3 = vector.load %arg7[%c0, %c0_1] : memref<8x128xf32, #tpu.memory_space<vmem>>, vector<8x128xf32>
    %c0_2 = arith.constant 0 : index
    %c0_3 = arith.constant 0 : index
    %4 = vector.load %arg2[%c0_2, %c0_3] : memref<8x64xbf16, #tpu.memory_space<vmem>>, vector<8x64xbf16>
    %c0_4 = arith.constant 0 : index
    %c0_5 = arith.constant 0 : index
    %5 = vector.load %arg3[%c0_4, %c0_5] : memref<64x128xbf16, #tpu.memory_space<vmem>>, vector<64x128xbf16>
    %cst = arith.constant dense<0.000000e+00> : vector<8x128xf32>
    %6 = tpu.matmul %4, %5, %cst {dimension_numbers = #tpu.dot_dimension_numbers<[1], [0], [0], [1], [0, 0, 1, 1], [], []>} : vector<8x64xbf16>, vector<64x128xbf16>, vector<8x128xf32> -> vector<8x128xf32>
    %7 = arith.addf %3, %6 : vector<8x128xf32>
    %c0_6 = arith.constant 0 : index
    %c0_7 = arith.constant 0 : index
    %8 = vector.load %arg7[%c0_6, %c0_7] : memref<8x128xf32, #tpu.memory_space<vmem>>, vector<8x128xf32>
    tpu.vector_store %arg7[%c0_6, %c0_7], %7 {strides = array<i32>} : memref<8x128xf32, #tpu.memory_space<vmem>>, vector<8x128xf32>,
    %c0_i32_8 = arith.constant 0 : i32
    %9 = arith.cmpi eq, %arg1, %c0_i32_8 : i32
    %10 = arith.extui %9 : i1 to i32
    %c0_i32_9 = arith.constant 0 : i32
    %11 = arith.cmpi ne, %10, %c0_i32_9 : i32
    scf.if %11 {
      %c0_10 = arith.constant 0 : index
      %c0_11 = arith.constant 0 : index
      %12 = vector.load %arg7[%c0_10, %c0_11] : memref<8x128xf32, #tpu.memory_space<vmem>>, vector<8x128xf32>
      %cst_12 = arith.constant dense<0.000000e+00> : vector<128xf32>
      %13 = vector.multi_reduction <add>, %12, %cst_12 [0] : vector<8x128xf32> to vector<128xf32>
      %14 = vector.shape_cast %13 : vector<128xf32> to vector<1x128xf32>
      %cst_13 = arith.constant 1.250000e-01 : f32
      %15 = vector.broadcast %cst_13 : f32 to vector<1x128xf32>
      %16 = arith.mulf %14, %15 : vector<1x128xf32>
      %17 = vector.broadcast %16 : vector<1x128xf32> to vector<8x128xf32>
      %18 = arith.subf %12, %17 : vector<8x128xf32>
      %19 = arith.mulf %18, %18 : vector<8x128xf32>
      %cst_14 = arith.constant dense<0.000000e+00> : vector<128xf32>
      %20 = vector.multi_reduction <add>, %19, %cst_14 [0] : vector<8x128xf32> to vector<128xf32>
      %21 = vector.shape_cast %20 : vector<128xf32> to vector<1x128xf32>
      %cst_15 = arith.constant 1.250000e-01 : f32
      %22 = vector.broadcast %cst_15 : f32 to vector<1x128xf32>
      %23 = arith.mulf %21, %22 : vector<1x128xf32>
      %c0_16 = arith.constant 0 : index
      %c0_17 = arith.constant 0 : index
      %24 = vector.load %arg4[%c0_16, %c0_17] : memref<1x128xf32, #tpu.memory_space<vmem>>, vector<1x128xf32>
      %cst_18 = arith.constant 9.99999974E-6 : f32
      %25 = vector.broadcast %cst_18 : f32 to vector<1x128xf32>
      %26 = arith.addf %23, %25 : vector<1x128xf32>
      %27 = math.rsqrt %26 : vector<1x128xf32>
      %28 = arith.mulf %24, %27 : vector<1x128xf32>
      %29 = vector.broadcast %28 : vector<1x128xf32> to vector<8x128xf32>
      %30 = arith.mulf %18, %29 : vector<8x128xf32>
      %c0_19 = arith.constant 0 : index
      %c0_20 = arith.constant 0 : index
      %31 = vector.load %arg5[%c0_19, %c0_20] : memref<1x128xf32, #tpu.memory_space<vmem>>, vector<1x128xf32>
      %32 = vector.broadcast %31 : vector<1x128xf32> to vector<8x128xf32>
      %33 = arith.addf %30, %32 : vector<8x128xf32>
      %cst_21 = arith.constant 0.000000e+00 : f32
      %34 = vector.broadcast %cst_21 : f32 to vector<8x128xf32>
      %35 = arith.maximumf %33, %34 : vector<8x128xf32>
      %c0_22 = arith.constant 0 : index
      %c0_23 = arith.constant 0 : index
      %36 = vector.load %arg6[%c0_22, %c0_23] : memref<8x128xf32, #tpu.memory_space<vmem>>, vector<8x128xf32>
      tpu.vector_store %arg6[%c0_22, %c0_23], %35 {strides = array<i32>} : memref<8x128xf32, #tpu.memory_space<vmem>>, vector<8x128xf32>,
    } else {
    }
    return
  }
  func.func @transform_0(%arg0: i32, %arg1: i32) -> (i32, i32) {
    %c0_i32 = arith.constant 0 : i32
    %c0_i32_0 = arith.constant 0 : i32
    return %c0_i32, %arg1 : i32, i32
  }
  func.func @transform_1(%arg0: i32, %arg1: i32) -> (i32, i32) {
    %c0_i32 = arith.constant 0 : i32
    return %arg1, %arg0 : i32, i32
  }
  func.func @transform_2(%arg0: i32, %arg1: i32) -> (i32, i32) {
    %c0_i32 = arith.constant 0 : i32
    %c0_i32_0 = arith.constant 0 : i32
    return %c0_i32, %arg0 : i32, i32
  }
  func.func @transform_3(%arg0: i32, %arg1: i32) -> (i32, i32) {
    %c0_i32 = arith.constant 0 : i32
    %c0_i32_0 = arith.constant 0 : i32
    return %c0_i32, %arg0 : i32, i32
  }
  func.func @transform_4(%arg0: i32, %arg1: i32) -> (i32, i32) {
    %c0_i32 = arith.constant 0 : i32
    %c0_i32_0 = arith.constant 0 : i32
    return %c0_i32, %arg0 : i32, i32
  }
}

</mosaic_0001>

<bundles_post_ra>
// kernel: linear_bnr_forward.1
= control target key start
LH: loop header
LB: loop body
LE: loop exit
PB: predicated region body
PF: predicated region fallthrough
CT: control target
= control target key end

     0   :  { %9 = vsyncpa [#allocation4], 0  ;;  %s321_s0 = inlined_call_operand.vmem [shape: bf16[8,64], index: 0, kind: input, shape index: {}]   ;;  %s322_s1 = inlined_call_operand.hbm [shape: bf16[64,128], index: 1, kind: input, shape index: {}]   ;;  %s323_s2 = inlined_call_operand.vmem [shape: f32[1,128], index: 2, kind: input, shape index: {}]   ;;  %s324_s3 = inlined_call_operand.vmem [shape: f32[1,128], index: 3, kind: input, shape index: {}]   ;;  %s325_s4 = inlined_call_operand.hbm [shape: f32[8,128], index: 4, kind: output, shape index: {}]  }
   0x1   :  { %10 = vsyncpa [#allocation5], 0  ;;  %s257_s15 = smov [#allocation3]   ;;  %s209_s19 = scalar_lea.hbm %s322_s1, 512 }
   0x2   :  { %s18_s16 = sshll.u32 %s257_s15, 4  ;;  %p210_p0 = scmp.ne.s32.totalorder %s322_s1, %s209_s19  ;;  %s19_s16 = int_to_ptr.vmem [resolvable:$true] %s18_s16 }
   0x3   :  { %p213_p1 = scmp.lt.u32.totalorder %s209_s19, %s322_s1 }
   0x5   :  { %p215_p2 = pnand %p213_p1, %p210_p0 }
   0x7   :  { %218 = shalt.err (!%p215_p2)
}
   0x8   :  { %s219_s24 = scalar_lea.vmem %s19_s16, 512  ;;  %p224_p4 = scmp.lt.s32.totalorder %s19_s16, %s19_s16 }
   0x9   :  { %p220_p3 = scmp.ne.s32.totalorder %s19_s16, %s219_s24  ;;  %p225_p5 = scmp.lt.s32.totalorder %s219_s24, %s219_s24 }
   0xb   :  { %p226_p6 = por %p225_p5, %p224_p4 }
   0xd   :  { %p227_p7 = pnand %p226_p6, %p220_p3 }
   0xf   :  { %230 = shalt.err (!%p227_p7)
}
  0x10   :  { %s258_s25 = smov 64   ;;  %s259_s26 = smov 4  }
  0x11   :  { %24 = dma.hbm_to_vmem [thread:$0]  %s322_s1, 512, %s19_s16, [#allocation4], %s258_s25, %s258_s25, %s259_s26  }
  0x12   :  { %253 = dma.done.wait [#allocation4], 512  }
  0x13   :  { %254 = vsyncadd [#allocation4], 4294966784  ;;  %v260_v0 = vmov 0.0   ;;  %vm261_vm0 = vmmov 0   ;;  %v203_v1 = vld [vmem:[#allocation3] sm:$0xff]   ;;  %v204_v2 = vld [vmem:[#allocation3 + $0x8] sm:$0xff]   ;;  %v143_v27 = vlaneseq }
  0x14   :  { %185 = vmatprep.subr.bf16.mxu0 %v260_v0  ;;  %193 = vmatprep.mubr.msk.bf16.mxu0 %vm261_vm0, %v260_v0  ;;  %v205_v3 = vld [vmem:[#allocation3 + $0x10] sm:$0xff]   ;;  %v206_v4 = vld [vmem:[#allocation3 + $0x18] sm:$0xff]   ;;  %v39_v5 = vld [vmem:[%s321_s0] sm:$0xf]  ;;  %vm72_vm1 = vcmask 523264   ;;  %s262_s7 = smov [#allocation6]  }
  0x15   :  { %186 = vmatpush3.bf16.msra.mxu0 %v203_v1  ;;  %v144_v28 = vshrl.u32 %v143_v27, 7  ;;  %v138_v29 = vld [vmem:[%s323_s2] sm:$0x1]  ;;  %s165_s8 = sshll.u32 %s262_s7, 4  ;;  %s166_s8 = int_to_ptr.vmem [resolvable:$true] %s165_s8 }
  0x16   :  { %187 = vmatprep.subr.bf16.mxu0 %v260_v0  ;;  %v179_v34 = vld [vmem:[%s324_s3] ss:$0 sm:$0xff]  ;;  %s231_s9 = scalar_lea.vmem %s166_s8, 128  ;;  %p236_p9 = scmp.lt.s32.totalorder %s166_s8, %s166_s8 }
  0x17   :  { %v145_v30 = vsub.s32 0, %v144_v28  ;;  %p232_p8 = scmp.ne.s32.totalorder %s166_s8, %s231_s9  ;;  %p237_p10 = scmp.lt.s32.totalorder %s231_s9, %s231_s9 }
  0x19   :  { %188 = vmatpush3.bf16.msra.mxu0 %v204_v2  ;;  %p238_p11 = por %p237_p10, %p236_p9 }
  0x1a   :  { %189 = vmatprep.subr.bf16.mxu0 %v260_v0 }
  0x1b   :  { %p239_p12 = pnand %p238_p11, %p232_p8 }
  0x1d   :  { %190 = vmatpush3.bf16.msra.mxu0 %v205_v3 }
  0x1e   :  { %191 = vmatprep.subr.bf16.mxu0 %v260_v0 }
  0x21   :  { %192 = vmatpush3.bf16.msra.mxu0 %v206_v4 }
  0x24   :  { %194 = vmatmul.mubr.msk.bf16.vlgmr.msra.gmra.mrb[0].mxu0 %vm72_vm1, %v39_v5 }
  0xf7   :  { %v110_v6 = vpop.f32.mrb[0].mxu0 }
  0xf8   :  { %v122_v7 = vrot.slane %v110_v6, 4  ;;  %v195_v8 = vpop.f32.mrb[1].mxu0 }
  0xf9   :  { %v113_v9 = vpop.f32.mrb[2].mxu0 }
  0xfa   :  { %v123_v10 = vadd.f32 %v122_v7, %v110_v6  ;;  %v196_v11 = vpop.f32.mrb[3].mxu0 }
  0xfc   :  { %v124_v12 = vrot.slane %v123_v10, 2 }
  0xfe   :  { %v125_v13 = vadd.f32 %v124_v12, %v123_v10 }
 0x100   :  { %v126_v14 = vrot.slane %v125_v13, 1 }
 0x102   :  { %v127_v15 = vadd.f32 %v126_v14, %v125_v13 }
 0x104   :  { %v128_v16 = vmul.f32 0.125, %v127_v15 }
 0x106   :  { %v129_v17 = vsub.f32 %v110_v6, %v128_v16 }
 0x108   :  { %v130_v18 = vmul.f32 %v129_v17, %v129_v17 }
 0x10a   :  { %v131_v19 = vrot.slane %v130_v18, 4 }
 0x10c   :  { %v132_v20 = vadd.f32 %v131_v19, %v130_v18 }
 0x10e   :  { %v133_v21 = vrot.slane %v132_v20, 2 }
 0x110   :  { %v134_v22 = vadd.f32 %v133_v21, %v132_v20 }
 0x112   :  { %v135_v23 = vrot.slane %v134_v22, 1 }
 0x114   :  { %v136_v24 = vadd.f32 %v135_v23, %v134_v22 }
 0x116   :  { %v137_v25 = vmul.f32 0.125, %v136_v24 }
 0x118   :  { %v139_v26 = vadd.f32 1e-05, %v137_v25 }
 0x11a   :  { %207 = vrsqrt.f32 %v139_v26 }
 0x124   :  { %v208_v31 = vpop.eup %207 }
 0x125   :  { %v141_v32 = vmul.f32 %v208_v31, %v138_v29 }
 0x127   :  { %v146_v33 = vrot.slane %v141_v32, %v145_v30 }
 0x129   :  { %v148_v35 = vmul.f32 %v146_v33, %v129_v17 }
 0x12b   :  { %v156_v36 = vadd.f32 %v179_v34, %v148_v35 }
 0x12d   :  { %v157_v37 = vmax.f32 %v156_v36, 0.0 }
 0x12f   :  { %158 = vst [vmem:[#allocation6] sm:$0xff] %v157_v37 }
 0x130   :  { %242 = shalt.err (!%p239_p12)
}
 0x131   :  { %s243_s11 = scalar_lea.hbm %s325_s4, 128 }
 0x132   :  { %p244_p13 = scmp.ne.s32.totalorder %s325_s4, %s243_s11  ;;  %p247_p0 = scmp.lt.u32.totalorder %s243_s11, %s325_s4 }
 0x134   :  { %p249_p1 = pnand %p247_p0, %p244_p13 }
 0x136   :  { %252 = shalt.err (!%p249_p1)
}
 0x137   :  { %168 = dma.vmem_to_hbm [thread:$0]  %s166_s8, 128, %s325_s4, [#allocation5]  }
 0x138   :  { %255 = dma.done.wait [#allocation5], 128  }
 0x139   :  { %256 = vsyncadd [#allocation5], 4294967168 }
 0x13a   :  { %172 = vsyncpa [#allocation4], 1 }
 0x13b   :  { %173 = vsyncpa [#allocation5], 1 }

</bundles_post_ra>
